<compile_context>
chip_gen: v7x
topology: tpu7x:2x2x1
jax: 0.10.0
libtpu: 0.0.40
codegen_flags: <defaults>
</compile_context>

<pallas_src>
import math

import numpy as np
import jax
import jax.numpy as jnp
from jax import lax
from jax.experimental import pallas as pl
from jax.experimental.pallas import tpu as pltpu


_NEG = -1e30                       # python float -> weak literal, never a captured constant
_HI = lax.Precision.HIGHEST        # used only on the reference's non-score matmuls


# ----------------------------- Pallas kernel --------------------------------
def _make_kernel(Bt, L, dm, H, D, U, eps):
    """All closed-over values are Python ints/floats (no traced constants)."""
    N = Bt * L

    def kernel(x_ref, wqkv_ref, bqkv_ref, wo_ref, w1_ref, w2_ref, bf1_ref,
               vec_ref, o_ref):
        # ---- load batch tile and flatten rows for the big matmuls -----------
        x = x_ref[...].reshape(N, dm)                          # (N, dm) f32

        # ---- fused Q/K/V projection: bf16 MXU inputs, f32 accumulation -------
        # 1/sqrt(D) is pre-folded into the Q columns of wqkv/bqkv host-side.
        qkv = jnp.dot(x.astype(jnp.bfloat16), wqkv_ref[...],
                      preferred_element_type=jnp.float32) + bqkv_ref[...]
        qkv_b = qkv.astype(jnp.bfloat16)       # bf16 copy -> half the relayout bytes

        # ---- gather heads into a leading batch dim: (H*Bt, L, D) -------------
        # Lane-slice + leading reshape + concat are the lowering-safe relayout ops.
        def heads(col0):
            return jnp.concatenate(
                [qkv_b[:, col0 + h * D: col0 + (h + 1) * D].reshape(Bt, L, D)
                 for h in range(H)], axis=0)

        q = heads(0)
        k = heads(dm)
        v = heads(2 * dm)

        # ---- scores for every (head, batch) in ONE batched MXU op ------------
        s = lax.dot_general(q, k, (((2,), (2,)), ((0,), (0,))),
                            preferred_element_type=jnp.float32)     # (HB, L, L) f32

        # ---- ProbSparse top-U threshold: kth-only peel, O(U*L^2) --------------
        # Only `kth` (HB, L, 1) is carried; no second live (HB, L, L) buffer.
        # Exact duplicates are peeled together (differs from torch.topk only on
        # measure-zero ties).  U = factor*log(L) is small & static.
        row_max = jnp.max(s, axis=-1, keepdims=True)            # 1st largest
        kth = row_max
        for _ in range(U - 1):
            kth = jnp.max(jnp.where(s < kth, s, _NEG), axis=-1, keepdims=True)

        # ---- masked softmax (row max always survives the strict '<' mask, so it
        # ---- doubles as the shift; dropout == identity at inference) ----------
        p = jnp.where(s < kth, 0.0, jnp.exp(s - row_max))
        p = p * pl.reciprocal(jnp.sum(p, axis=-1, keepdims=True), approx=True)

        # ---- context = P @ V, batched over heads*batches, bf16 in / f32 acc ---
        ctx = lax.dot_general(p.astype(jnp.bfloat16), v,
                              (((2,), (1,)), ((0,), (0,))),
                              preferred_element_type=jnp.float32)   # (HB, L, D)
        # back to one lane-dense (N, dm) activation (head h -> columns h*D:(h+1)*D)
        ctx = jnp.concatenate(
            [ctx[h * Bt:(h + 1) * Bt].reshape(N, D) for h in range(H)], axis=-1)

        # ---- packed per-feature vectors ---------------------------------------
        bo  = vec_ref[0:1, :]
        g1  = vec_ref[1:2, :]
        be1 = vec_ref[2:3, :]
        bf2 = vec_ref[3:4, :]
        g2  = vec_ref[4:5, :]
        be2 = vec_ref[5:6, :]

        def layer_norm(t, g, b):
            mu = jnp.mean(t, axis=-1, keepdims=True)
            var = jnp.mean((t - mu) * (t - mu), axis=-1, keepdims=True)
            return (t - mu) * lax.rsqrt(var + eps) * g + b

        # ---- output projection + residual + LayerNorm1 ------------------------
        attn_out = jnp.dot(ctx.astype(jnp.bfloat16), wo_ref[...],
                           preferred_element_type=jnp.float32) + bo
        y1 = layer_norm(x + attn_out, g1, be1)

        # ---- feed-forward (Linear -> ReLU -> Linear) + residual + LayerNorm2 --
        h_mid = jnp.dot(y1.astype(jnp.bfloat16), w1_ref[...],
                        preferred_element_type=jnp.float32) + bf1_ref[...]
        h_mid = jnp.maximum(h_mid, 0.0)
        ff = jnp.dot(h_mid.astype(jnp.bfloat16), w2_ref[...],
                     preferred_element_type=jnp.float32) + bf2
        y2 = layer_norm(y1 + ff, g2, be2)

        o_ref[...] = y2.reshape(Bt, L, dm)

    return kernel


# ------------------------------- helpers -------------------------------------
def _num_topk(L, attn_factor):
    # Guard U >= 1 (factor*log(L) < 1 would otherwise mask every score).
    return max(1, min(L, int(attn_factor * math.log(L)) if L > 1 else L))


def _pack_qkv(params, D):
    """Fused (dm, 3dm) QKV weight with 1/sqrt(D) folded into the Q columns.

    Shared by the kernel wrapper and the reference so the (discrete) top-U
    threshold is computed from bit-identical bf16 score arithmetic.
    """
    scale = 1.0 / math.sqrt(D)
    wqkv = jnp.concatenate([params["wq"] * scale, params["wk"], params["wv"]],
                           axis=1).astype(jnp.bfloat16)
    bqkv = jnp.concatenate([params["bq"] * scale, params["bk"], params["bv"]], axis=1)
    return wqkv, bqkv


def _pick_batch_tile(B, L, target_rows=256, min_steps=2):
    # Batch enough rows per grid step so the row-parallel matmuls present
    # Bt*L ~ 256 rows (fills v6e/v7x's 256-wide MXU; v5e simply takes 2 passes),
    # while Bt divides B.  Prefer >= min_steps grid steps (pipelining slack /
    # megacore sharding on v7x) when that keeps >= 128 MXU rows per step.
    divisors = [d for d in range(1, B + 1) if B % d == 0]
    cands = [d for d in divisors if d * L <= max(target_rows, L)] or [1]
    bt = max(cands)
    if B // bt < min_steps:
        smaller = [d for d in cands if B // d >= min_steps and d * L >= 128]
        if smaller:
            bt = max(smaller)
    return bt


def _vmem_limit_bytes(Bt, L, dm, dff, H):
    # Rough per-step footprint: double-buffered x/out tiles, (double-buffered)
    # resident weights, and the live in-kernel tensors (qkv, scores, FFN mid, ...).
    N, HB = Bt * L, H * Bt
    est = 0
    est += 2 * 2 * N * dm * 4                                       # x/out tiles
    est += 2 * (3 * dm * dm * 2 + dm * dm * 2 + 2 * dm * dff * 2)   # bf16 weights
    est += 2 * (3 * dm + dff + 6 * dm) * 4                          # bias/LN vectors
    est += N * 3 * dm * (4 + 2)                                     # qkv f32 + bf16
    est += 3 * HB * L * L * 4                                       # scores/softmax
    est += (N * dff + 3 * N * dm) * 4                               # FFN mid, ctx, y1
    # Clamp to a value legal on every generation (v7x physical VMEM = 64 MiB).
    return int(min(64 * 2 ** 20, max(32 * 2 ** 20, 2 * est)))


# ------------------------------- wrapper --------------------------------------
def encoder_layer_pallas(x, params, *, nhead, attn_factor, eps=1e-5):
    B, L, dm = x.shape
    assert dm % nhead == 0
    D = dm // nhead
    dff = params["w1"].shape[1]
    U = _num_topk(L, attn_factor)
    Bt = _pick_batch_tile(B, L)

    # ---- host-side packing ----------------------------------------------------
    wqkv, bqkv = _pack_qkv(params, D)
    vecs = jnp.concatenate([params["bo"], params["g1"], params["be1"],
                            params["bf2"], params["g2"], params["be2"]], axis=0)
    wo = params["wo"].astype(jnp.bfloat16)   # bf16 MXU inputs, half the DMA bytes
    w1 = params["w1"].astype(jnp.bfloat16)
    w2 = params["w2"].astype(jnp.bfloat16)
    bf1 = params["bf1"]

    kernel = _make_kernel(Bt, L, dm, nhead, D, U, float(eps))
    weights = [wqkv, bqkv, wo, w1, w2, bf1, vecs]

    def full2d(a):
        # Weights are grid-invariant (constant index_map).  NOTE: they could be
        # single-buffered (pipeline_mode=pl.Buffered(1)) to reclaim VMEM for a
        # larger Bt; kept default-buffered here for maximum lowering safety.
        return pl.BlockSpec(a.shape, lambda b: (0, 0))

    grid_spec = pltpu.PrefetchScalarGridSpec(
        num_scalar_prefetch=0,
        grid=(B // Bt,),
        in_specs=[pl.BlockSpec((Bt, L, dm), lambda b: (b, 0, 0))]
                 + [full2d(a) for a in weights],
        out_specs=pl.BlockSpec((Bt, L, dm), lambda b: (b, 0, 0)),
    )

    return pl.pallas_call(
        kernel,
        out_shape=jax.ShapeDtypeStruct((B, L, dm), jnp.float32),
        grid_spec=grid_spec,
        compiler_params=pltpu.CompilerParams(
            dimension_semantics=("parallel",),
            vmem_limit_bytes=_vmem_limit_bytes(Bt, L, dm, dff, nhead)),
    )(x, *weights)


# --------------------------- pure-JAX reference -------------------------------
def encoder_layer_ref(x, p, *, nhead, attn_factor, eps=1e-5):
    B, L, dm = x.shape
    D = dm // nhead
    U = _num_topk(L, attn_factor)

    # The top-U mask is a *discrete* decision, so the reference mirrors the
    # kernel's bf16-in / f32-accumulate score arithmetic exactly (same packed,
    # pre-scaled bf16 wqkv); everything downstream stays f32 / HIGHEST.
    wqkv, bqkv = _pack_qkv(p, D)
    qkv = jnp.dot(x.astype(jnp.bfloat16), wqkv,
                  preferred_element_type=jnp.float32) + bqkv

    def split_heads(t):
        return t.reshape(B, L, nhead, D).transpose(0, 2, 1, 3)      # (B,H,L,D)

    q = split_heads(qkv[..., 0:dm]).astype(jnp.bfloat16)
    k = split_heads(qkv[..., dm:2 * dm]).astype(jnp.bfloat16)
    v = split_heads(qkv[..., 2 * dm:3 * dm])
    s = jnp.einsum("bhqd,bhkd->bhqk", q, k,
                   preferred_element_type=jnp.float32)   # 1/sqrt(D) already in Q
    kth = lax.top_k(s, U)[0][..., -1:]
    s = jnp.where(s < kth, -jnp.inf, s)
    attn = jax.nn.softmax(s, axis=-1)
    ctx = jnp.einsum("bhqk,bhkd->bhqd", attn, v,
                     precision=_HI).transpose(0, 2, 1, 3).reshape(B, L, dm)
    out = jnp.dot(ctx, p["wo"], precision=_HI) + p["bo"]

    def ln(t, g, b):
        mu = jnp.mean(t, axis=-1, keepdims=True)
        var = jnp.mean((t - mu) ** 2, axis=-1, keepdims=True)
        return (t - mu) * lax.rsqrt(var + eps) * g + b

    y1 = ln(x + out, p["g1"], p["be1"])
    h = jnp.maximum(jnp.dot(y1, p["w1"], precision=_HI) + p["bf1"], 0.0)
    ff = jnp.dot(h, p["w2"], precision=_HI) + p["bf2"]
    return ln(y1 + ff, p["g2"], p["be2"])


# ----------------------------------- main -------------------------------------
if __name__ == "__main__":
    # small shapes consistent with the module
    B, L, d_model, nhead, dim_ff = 2, 8, 32, 4, 64
    attn_factor = 1          # -> U = int(log(8)) = 2 < L : sparsification is active
    # dropout layers are identity at inference; mask defaults to None.

    key = jax.random.PRNGKey(0)
    ks = jax.random.split(key, 20)

    def w(k, shape, scale=0.1):
        return (scale * jax.random.normal(k, shape)).astype(jnp.float32)

    # Linear weights stored already transposed: (in_features, out_features)
    params = {
        "wq": w(ks[0], (d_model, d_model)), "bq": w(ks[1], (1, d_model)),
        "wk": w(ks[2], (d_model, d_model)), "bk": w(ks[3], (1, d_model)),
        "wv": w(ks[4], (d_model, d_model)), "bv": w(ks[5], (1, d_model)),
        "wo": w(ks[6], (d_model, d_model)), "bo": w(ks[7], (1, d_model)),
        "g1": (1.0 + 0.1 * jax.random.normal(ks[8], (1, d_model))).astype(jnp.float32),
        "be1": w(ks[9], (1, d_model)),
        "w1": w(ks[10], (d_model, dim_ff)), "bf1": w(ks[11], (1, dim_ff)),
        "w2": w(ks[12], (dim_ff, d_model)), "bf2": w(ks[13], (1, d_model)),
        "g2": (1.0 + 0.1 * jax.random.normal(ks[14], (1, d_model))).astype(jnp.float32),
        "be2": w(ks[15], (1, d_model)),
    }

    x = jax.random.normal(ks[16], (B, L, d_model), dtype=jnp.float32)

    out = jax.block_until_ready(
        encoder_layer_pallas(x, params, nhead=nhead, attn_factor=attn_factor))
    ref = jax.block_until_ready(
        encoder_layer_ref(x, params, nhead=nhead, attn_factor=attn_factor))

    # Tolerance bounded by the bf16 MXU inputs on the P@V / out-proj / FFN path;
    # the score path uses the same bf16 arithmetic in kernel & reference, so the
    # discrete top-U mask agrees and differences stay at bf16-rounding scale.
    np.testing.assert_allclose(np.asarray(out), np.asarray(ref), rtol=3e-2, atol=3e-2)

    print("KERNEL_OK")
</pallas_src>

<mosaic_0001>
module attributes {stable_mosaic.version = 11 : i64} {
  func.func @kernel(%arg0: i32, %arg1: memref<2x8x32xf32, #tpu.memory_space<vmem>>, %arg2: memref<32x96xbf16, #tpu.memory_space<vmem>>, %arg3: memref<1x96xf32, #tpu.memory_space<vmem>>, %arg4: memref<32x32xbf16, #tpu.memory_space<vmem>>, %arg5: memref<32x64xbf16, #tpu.memory_space<vmem>>, %arg6: memref<64x32xbf16, #tpu.memory_space<vmem>>, %arg7: memref<1x64xf32, #tpu.memory_space<vmem>>, %arg8: memref<6x32xf32, #tpu.memory_space<vmem>>, %arg9: memref<2x8x32xf32, #tpu.memory_space<vmem>>) attributes {dimension_semantics = [#tpu.dimension_semantics<parallel>], iteration_bounds = array<i64: 1>, scalar_prefetch = 0 : i64, scratch_operands = 0 : i64, tpu.core_type = #tpu.core_type<tc>, window_params = [{transform_indices = @transform_0, window_bounds = array<i64: 2, 8, 32>}, {pipeline_mode = #tpu.pipeline_mode<synchronous>, transform_indices = @transform_1, window_bounds = array<i64: 32, 96>}, {pipeline_mode = #tpu.pipeline_mode<synchronous>, transform_indices = @transform_2, window_bounds = array<i64: 1, 96>}, {pipeline_mode = #tpu.pipeline_mode<synchronous>, transform_indices = @transform_3, window_bounds = array<i64: 32, 32>}, {pipeline_mode = #tpu.pipeline_mode<synchronous>, transform_indices = @transform_4, window_bounds = array<i64: 32, 64>}, {pipeline_mode = #tpu.pipeline_mode<synchronous>, transform_indices = @transform_5, window_bounds = array<i64: 64, 32>}, {pipeline_mode = #tpu.pipeline_mode<synchronous>, transform_indices = @transform_6, window_bounds = array<i64: 1, 64>}, {pipeline_mode = #tpu.pipeline_mode<synchronous>, transform_indices = @transform_7, window_bounds = array<i64: 6, 32>}, {transform_indices = @transform_8, window_bounds = array<i64: 2, 8, 32>}]} {
    %c0 = arith.constant 0 : index
    %c0_0 = arith.constant 0 : index
    %c0_1 = arith.constant 0 : index
    %0 = vector.load %arg1[%c0, %c0_0, %c0_1] : memref<2x8x32xf32, #tpu.memory_space<vmem>>, vector<2x8x32xf32>
    %1 = vector.shape_cast %0 : vector<2x8x32xf32> to vector<16x32xf32>
    %2 = arith.truncf %1 : vector<16x32xf32> to vector<16x32xbf16>
    %c0_2 = arith.constant 0 : index
    %c0_3 = arith.constant 0 : index
    %3 = vector.load %arg2[%c0_2, %c0_3] : memref<32x96xbf16, #tpu.memory_space<vmem>>, vector<32x96xbf16>
    %cst = arith.constant dense<0.000000e+00> : vector<16x96xf32>
    %4 = tpu.matmul %2, %3, %cst {dimension_numbers = #tpu.dot_dimension_numbers<[1], [0], [0], [1], [0, 0, 1, 1], [], []>} : vector<16x32xbf16>, vector<32x96xbf16>, vector<16x96xf32> -> vector<16x96xf32>
    %c0_4 = arith.constant 0 : index
    %c0_5 = arith.constant 0 : index
    %5 = vector.load %arg3[%c0_4, %c0_5] : memref<1x96xf32, #tpu.memory_space<vmem>>, vector<1x96xf32>
    %6 = vector.broadcast %5 : vector<1x96xf32> to vector<16x96xf32>
    %7 = arith.addf %4, %6 : vector<16x96xf32>
    %8 = arith.truncf %7 : vector<16x96xf32> to vector<16x96xbf16>
    %9 = vector.extract_strided_slice %8 {offsets = [0, 0], sizes = [16, 8], strides = [1, 1]} : vector<16x96xbf16> to vector<16x8xbf16>
    %10 = vector.shape_cast %9 : vector<16x8xbf16> to vector<2x8x8xbf16>
    %11 = vector.extract_strided_slice %8 {offsets = [0, 8], sizes = [16, 8], strides = [1, 1]} : vector<16x96xbf16> to vector<16x8xbf16>
    %12 = vector.shape_cast %11 : vector<16x8xbf16> to vector<2x8x8xbf16>
    %13 = vector.extract_strided_slice %8 {offsets = [0, 16], sizes = [16, 8], strides = [1, 1]} : vector<16x96xbf16> to vector<16x8xbf16>
    %14 = vector.shape_cast %13 : vector<16x8xbf16> to vector<2x8x8xbf16>
    %15 = vector.extract_strided_slice %8 {offsets = [0, 24], sizes = [16, 8], strides = [1, 1]} : vector<16x96xbf16> to vector<16x8xbf16>
    %16 = vector.shape_cast %15 : vector<16x8xbf16> to vector<2x8x8xbf16>
    %17 = tpu.concatenate %10, %12, %14, %16 in 0 : vector<2x8x8xbf16>, vector<2x8x8xbf16>, vector<2x8x8xbf16>, vector<2x8x8xbf16> -> vector<8x8x8xbf16>
    %18 = vector.extract_strided_slice %8 {offsets = [0, 32], sizes = [16, 8], strides = [1, 1]} : vector<16x96xbf16> to vector<16x8xbf16>
    %19 = vector.shape_cast %18 : vector<16x8xbf16> to vector<2x8x8xbf16>
    %20 = vector.extract_strided_slice %8 {offsets = [0, 40], sizes = [16, 8], strides = [1, 1]} : vector<16x96xbf16> to vector<16x8xbf16>
    %21 = vector.shape_cast %20 : vector<16x8xbf16> to vector<2x8x8xbf16>
    %22 = vector.extract_strided_slice %8 {offsets = [0, 48], sizes = [16, 8], strides = [1, 1]} : vector<16x96xbf16> to vector<16x8xbf16>
    %23 = vector.shape_cast %22 : vector<16x8xbf16> to vector<2x8x8xbf16>
    %24 = vector.extract_strided_slice %8 {offsets = [0, 56], sizes = [16, 8], strides = [1, 1]} : vector<16x96xbf16> to vector<16x8xbf16>
    %25 = vector.shape_cast %24 : vector<16x8xbf16> to vector<2x8x8xbf16>
    %26 = tpu.concatenate %19, %21, %23, %25 in 0 : vector<2x8x8xbf16>, vector<2x8x8xbf16>, vector<2x8x8xbf16>, vector<2x8x8xbf16> -> vector<8x8x8xbf16>
    %27 = vector.extract_strided_slice %8 {offsets = [0, 64], sizes = [16, 8], strides = [1, 1]} : vector<16x96xbf16> to vector<16x8xbf16>
    %28 = vector.shape_cast %27 : vector<16x8xbf16> to vector<2x8x8xbf16>
    %29 = vector.extract_strided_slice %8 {offsets = [0, 72], sizes = [16, 8], strides = [1, 1]} : vector<16x96xbf16> to vector<16x8xbf16>
    %30 = vector.shape_cast %29 : vector<16x8xbf16> to vector<2x8x8xbf16>
    %31 = vector.extract_strided_slice %8 {offsets = [0, 80], sizes = [16, 8], strides = [1, 1]} : vector<16x96xbf16> to vector<16x8xbf16>
    %32 = vector.shape_cast %31 : vector<16x8xbf16> to vector<2x8x8xbf16>
    %33 = vector.extract_strided_slice %8 {offsets = [0, 88], sizes = [16, 8], strides = [1, 1]} : vector<16x96xbf16> to vector<16x8xbf16>
    %34 = vector.shape_cast %33 : vector<16x8xbf16> to vector<2x8x8xbf16>
    %35 = tpu.concatenate %28, %30, %32, %34 in 0 : vector<2x8x8xbf16>, vector<2x8x8xbf16>, vector<2x8x8xbf16>, vector<2x8x8xbf16> -> vector<8x8x8xbf16>
    %cst_6 = arith.constant dense<0.000000e+00> : vector<8x8x8xf32>
    %36 = tpu.matmul %17, %26, %cst_6 {dimension_numbers = #tpu.dot_dimension_numbers<[2], [2], [1], [1], [0, 0, 0, 1, 1, 1], [0], [0]>} : vector<8x8x8xbf16>, vector<8x8x8xbf16>, vector<8x8x8xf32> -> vector<8x8x8xf32>
    %cst_7 = arith.constant dense<0xFF800000> : vector<8x8xf32>
    %37 = vector.multi_reduction <maximumf>, %36, %cst_7 [2] : vector<8x8x8xf32> to vector<8x8xf32>
    %38 = vector.shape_cast %37 : vector<8x8xf32> to vector<8x8x1xf32>
    %39 = vector.broadcast %38 : vector<8x8x1xf32> to vector<8x8x8xf32>
    %40 = arith.cmpf olt, %36, %39 : vector<8x8x8xf32>
    %cst_8 = arith.constant -1.000000e+30 : f32
    %41 = vector.broadcast %cst_8 : f32 to vector<8x8x8xf32>
    %42 = arith.select %40, %36, %41 : vector<8x8x8xi1>, vector<8x8x8xf32>
    %cst_9 = arith.constant dense<0xFF800000> : vector<8x8xf32>
    %43 = vector.multi_reduction <maximumf>, %42, %cst_9 [2] : vector<8x8x8xf32> to vector<8x8xf32>
    %44 = vector.shape_cast %43 : vector<8x8xf32> to vector<8x8x1xf32>
    %45 = vector.broadcast %44 : vector<8x8x1xf32> to vector<8x8x8xf32>
    %46 = arith.cmpf olt, %36, %45 : vector<8x8x8xf32>
    %47 = vector.broadcast %38 : vector<8x8x1xf32> to vector<8x8x8xf32>
    %48 = arith.subf %36, %47 : vector<8x8x8xf32>
    %49 = math.exp %48 : vector<8x8x8xf32>
    %cst_10 = arith.constant 0.000000e+00 : f32
    %50 = vector.broadcast %cst_10 : f32 to vector<8x8x8xf32>
    %51 = arith.select %46, %50, %49 : vector<8x8x8xi1>, vector<8x8x8xf32>
    %cst_11 = arith.constant dense<0.000000e+00> : vector<8x8xf32>
    %52 = vector.multi_reduction <add>, %51, %cst_11 [2] : vector<8x8x8xf32> to vector<8x8xf32>
    %53 = vector.shape_cast %52 : vector<8x8xf32> to vector<8x8x1xf32>
    %54 = tpu.reciprocal %53 {approx = true} : vector<8x8x1xf32> -> vector<8x8x1xf32>
    %55 = vector.broadcast %54 : vector<8x8x1xf32> to vector<8x8x8xf32>
    %56 = arith.mulf %51, %55 : vector<8x8x8xf32>
    %57 = arith.truncf %56 : vector<8x8x8xf32> to vector<8x8x8xbf16>
    %cst_12 = arith.constant dense<0.000000e+00> : vector<8x8x8xf32>
    %58 = tpu.matmul %57, %35, %cst_12 {dimension_numbers = #tpu.dot_dimension_numbers<[2], [1], [1], [2], [0, 0, 0, 1, 1, 2], [0], [0]>} : vector<8x8x8xbf16>, vector<8x8x8xbf16>, vector<8x8x8xf32> -> vector<8x8x8xf32>
    %59 = vector.extract_strided_slice %58 {offsets = [0, 0, 0], sizes = [2, 8, 8], strides = [1, 1, 1]} : vector<8x8x8xf32> to vector<2x8x8xf32>
    %60 = vector.shape_cast %59 : vector<2x8x8xf32> to vector<16x8xf32>
    %61 = vector.extract_strided_slice %58 {offsets = [2, 0, 0], sizes = [2, 8, 8], strides = [1, 1, 1]} : vector<8x8x8xf32> to vector<2x8x8xf32>
    %62 = vector.shape_cast %61 : vector<2x8x8xf32> to vector<16x8xf32>
    %63 = vector.extract_strided_slice %58 {offsets = [4, 0, 0], sizes = [2, 8, 8], strides = [1, 1, 1]} : vector<8x8x8xf32> to vector<2x8x8xf32>
    %64 = vector.shape_cast %63 : vector<2x8x8xf32> to vector<16x8xf32>
    %65 = vector.extract_strided_slice %58 {offsets = [6, 0, 0], sizes = [2, 8, 8], strides = [1, 1, 1]} : vector<8x8x8xf32> to vector<2x8x8xf32>
    %66 = vector.shape_cast %65 : vector<2x8x8xf32> to vector<16x8xf32>
    %67 = tpu.concatenate %60, %62, %64, %66 in 1 : vector<16x8xf32>, vector<16x8xf32>, vector<16x8xf32>, vector<16x8xf32> -> vector<16x32xf32>
    %c0_13 = arith.constant 0 : index
    %c0_14 = arith.constant 0 : index
    %68 = vector.load %arg8[%c0_13, %c0_14] : memref<6x32xf32, #tpu.memory_space<vmem>>, vector<1x32xf32>
    %c1 = arith.constant 1 : index
    %c0_15 = arith.constant 0 : index
    %69 = vector.load %arg8[%c1, %c0_15] : memref<6x32xf32, #tpu.memory_space<vmem>>, vector<1x32xf32>
    %c2 = arith.constant 2 : index
    %c0_16 = arith.constant 0 : index
    %70 = vector.load %arg8[%c2, %c0_16] : memref<6x32xf32, #tpu.memory_space<vmem>>, vector<1x32xf32>
    %c3 = arith.constant 3 : index
    %c0_17 = arith.constant 0 : index
    %71 = vector.load %arg8[%c3, %c0_17] : memref<6x32xf32, #tpu.memory_space<vmem>>, vector<1x32xf32>
    %c4 = arith.constant 4 : index
    %c0_18 = arith.constant 0 : index
    %72 = vector.load %arg8[%c4, %c0_18] : memref<6x32xf32, #tpu.memory_space<vmem>>, vector<1x32xf32>
    %c5 = arith.constant 5 : index
    %c0_19 = arith.constant 0 : index
    %73 = vector.load %arg8[%c5, %c0_19] : memref<6x32xf32, #tpu.memory_space<vmem>>, vector<1x32xf32>
    %74 = arith.truncf %67 : vector<16x32xf32> to vector<16x32xbf16>
    %c0_20 = arith.constant 0 : index
    %c0_21 = arith.constant 0 : index
    %75 = vector.load %arg4[%c0_20, %c0_21] : memref<32x32xbf16, #tpu.memory_space<vmem>>, vector<32x32xbf16>
    %cst_22 = arith.constant dense<0.000000e+00> : vector<16x32xf32>
    %76 = tpu.matmul %74, %75, %cst_22 {dimension_numbers = #tpu.dot_dimension_numbers<[1], [0], [0], [1], [0, 0, 1, 1], [], []>} : vector<16x32xbf16>, vector<32x32xbf16>, vector<16x32xf32> -> vector<16x32xf32>
    %77 = vector.broadcast %68 : vector<1x32xf32> to vector<16x32xf32>
    %78 = arith.addf %76, %77 : vector<16x32xf32>
    %79 = arith.addf %1, %78 : vector<16x32xf32>
    %cst_23 = arith.constant dense<0.000000e+00> : vector<16xf32>
    %80 = vector.multi_reduction <add>, %79, %cst_23 [1] : vector<16x32xf32> to vector<16xf32>
    %81 = vector.shape_cast %80 : vector<16xf32> to vector<16x1xf32>
    %cst_24 = arith.constant 3.200000e+01 : f32
    %82 = vector.broadcast %cst_24 : f32 to vector<16x1xf32>
    %83 = arith.divf %81, %82 : vector<16x1xf32>
    %84 = vector.broadcast %83 : vector<16x1xf32> to vector<16x32xf32>
    %85 = arith.subf %79, %84 : vector<16x32xf32>
    %86 = vector.broadcast %83 : vector<16x1xf32> to vector<16x32xf32>
    %87 = arith.subf %79, %86 : vector<16x32xf32>
    %88 = arith.mulf %85, %87 : vector<16x32xf32>
    %cst_25 = arith.constant dense<0.000000e+00> : vector<16xf32>
    %89 = vector.multi_reduction <add>, %88, %cst_25 [1] : vector<16x32xf32> to vector<16xf32>
    %90 = vector.shape_cast %89 : vector<16xf32> to vector<16x1xf32>
    %cst_26 = arith.constant 3.200000e+01 : f32
    %91 = vector.broadcast %cst_26 : f32 to vector<16x1xf32>
    %92 = arith.divf %90, %91 : vector<16x1xf32>
    %93 = vector.broadcast %83 : vector<16x1xf32> to vector<16x32xf32>
    %94 = arith.subf %79, %93 : vector<16x32xf32>
    %cst_27 = arith.constant 9.99999974E-6 : f32
    %95 = vector.broadcast %cst_27 : f32 to vector<16x1xf32>
    %96 = arith.addf %92, %95 : vector<16x1xf32>
    %97 = math.rsqrt %96 : vector<16x1xf32>
    %98 = vector.broadcast %97 : vector<16x1xf32> to vector<16x32xf32>
    %99 = arith.mulf %94, %98 : vector<16x32xf32>
    %100 = vector.broadcast %69 : vector<1x32xf32> to vector<16x32xf32>
    %101 = arith.mulf %99, %100 : vector<16x32xf32>
    %102 = vector.broadcast %70 : vector<1x32xf32> to vector<16x32xf32>
    %103 = arith.addf %101, %102 : vector<16x32xf32>
    %104 = arith.truncf %103 : vector<16x32xf32> to vector<16x32xbf16>
    %c0_28 = arith.constant 0 : index
    %c0_29 = arith.constant 0 : index
    %105 = vector.load %arg5[%c0_28, %c0_29] : memref<32x64xbf16, #tpu.memory_space<vmem>>, vector<32x64xbf16>
    %cst_30 = arith.constant dense<0.000000e+00> : vector<16x64xf32>
    %106 = tpu.matmul %104, %105, %cst_30 {dimension_numbers = #tpu.dot_dimension_numbers<[1], [0], [0], [1], [0, 0, 1, 1], [], []>} : vector<16x32xbf16>, vector<32x64xbf16>, vector<16x64xf32> -> vector<16x64xf32>
    %c0_31 = arith.constant 0 : index
    %c0_32 = arith.constant 0 : index
    %107 = vector.load %arg7[%c0_31, %c0_32] : memref<1x64xf32, #tpu.memory_space<vmem>>, vector<1x64xf32>
    %108 = vector.broadcast %107 : vector<1x64xf32> to vector<16x64xf32>
    %109 = arith.addf %106, %108 : vector<16x64xf32>
    %cst_33 = arith.constant 0.000000e+00 : f32
    %110 = vector.broadcast %cst_33 : f32 to vector<16x64xf32>
    %111 = arith.maximumf %109, %110 : vector<16x64xf32>
    %112 = arith.truncf %111 : vector<16x64xf32> to vector<16x64xbf16>
    %c0_34 = arith.constant 0 : index
    %c0_35 = arith.constant 0 : index
    %113 = vector.load %arg6[%c0_34, %c0_35] : memref<64x32xbf16, #tpu.memory_space<vmem>>, vector<64x32xbf16>
    %cst_36 = arith.constant dense<0.000000e+00> : vector<16x32xf32>
    %114 = tpu.matmul %112, %113, %cst_36 {dimension_numbers = #tpu.dot_dimension_numbers<[1], [0], [0], [1], [0, 0, 1, 1], [], []>} : vector<16x64xbf16>, vector<64x32xbf16>, vector<16x32xf32> -> vector<16x32xf32>
    %115 = vector.broadcast %71 : vector<1x32xf32> to vector<16x32xf32>
    %116 = arith.addf %114, %115 : vector<16x32xf32>
    %117 = arith.addf %103, %116 : vector<16x32xf32>
    %cst_37 = arith.constant dense<0.000000e+00> : vector<16xf32>
    %118 = vector.multi_reduction <add>, %117, %cst_37 [1] : vector<16x32xf32> to vector<16xf32>
    %119 = vector.shape_cast %118 : vector<16xf32> to vector<16x1xf32>
    %cst_38 = arith.constant 3.200000e+01 : f32
    %120 = vector.broadcast %cst_38 : f32 to vector<16x1xf32>
    %121 = arith.divf %119, %120 : vector<16x1xf32>
    %122 = vector.broadcast %121 : vector<16x1xf32> to vector<16x32xf32>
    %123 = arith.subf %117, %122 : vector<16x32xf32>
    %124 = vector.broadcast %121 : vector<16x1xf32> to vector<16x32xf32>
    %125 = arith.subf %117, %124 : vector<16x32xf32>
    %126 = arith.mulf %123, %125 : vector<16x32xf32>
    %cst_39 = arith.constant dense<0.000000e+00> : vector<16xf32>
    %127 = vector.multi_reduction <add>, %126, %cst_39 [1] : vector<16x32xf32> to vector<16xf32>
    %128 = vector.shape_cast %127 : vector<16xf32> to vector<16x1xf32>
    %cst_40 = arith.constant 3.200000e+01 : f32
    %129 = vector.broadcast %cst_40 : f32 to vector<16x1xf32>
    %130 = arith.divf %128, %129 : vector<16x1xf32>
    %131 = vector.broadcast %121 : vector<16x1xf32> to vector<16x32xf32>
    %132 = arith.subf %117, %131 : vector<16x32xf32>
    %cst_41 = arith.constant 9.99999974E-6 : f32
    %133 = vector.broadcast %cst_41 : f32 to vector<16x1xf32>
    %134 = arith.addf %130, %133 : vector<16x1xf32>
    %135 = math.rsqrt %134 : vector<16x1xf32>
    %136 = vector.broadcast %135 : vector<16x1xf32> to vector<16x32xf32>
    %137 = arith.mulf %132, %136 : vector<16x32xf32>
    %138 = vector.broadcast %72 : vector<1x32xf32> to vector<16x32xf32>
    %139 = arith.mulf %137, %138 : vector<16x32xf32>
    %140 = vector.broadcast %73 : vector<1x32xf32> to vector<16x32xf32>
    %141 = arith.addf %139, %140 : vector<16x32xf32>
    %142 = vector.shape_cast %141 : vector<16x32xf32> to vector<2x8x32xf32>
    %c0_42 = arith.constant 0 : index
    %c0_43 = arith.constant 0 : index
    %c0_44 = arith.constant 0 : index
    %143 = vector.load %arg9[%c0_42, %c0_43, %c0_44] : memref<2x8x32xf32, #tpu.memory_space<vmem>>, vector<2x8x32xf32>
    tpu.vector_store %arg9[%c0_42, %c0_43, %c0_44], %142 {strides = array<i32>} : memref<2x8x32xf32, #tpu.memory_space<vmem>>, vector<2x8x32xf32>,
    return
  }
  func.func @transform_0(%arg0: i32) -> (i32, i32, i32) {
    %c0_i32 = arith.constant 0 : i32
    %c0_i32_0 = arith.constant 0 : i32
    %c0_i32_1 = arith.constant 0 : i32
    return %arg0, %c0_i32, %c0_i32_0 : i32, i32, i32
  }
  func.func @transform_1(%arg0: i32) -> (i32, i32) {
    %c0_i32 = arith.constant 0 : i32
    %c0_i32_0 = arith.constant 0 : i32
    %c0_i32_1 = arith.constant 0 : i32
    return %c0_i32, %c0_i32_0 : i32, i32
  }
  func.func @transform_2(%arg0: i32) -> (i32, i32) {
    %c0_i32 = arith.constant 0 : i32
    %c0_i32_0 = arith.constant 0 : i32
    %c0_i32_1 = arith.constant 0 : i32
    return %c0_i32, %c0_i32_0 : i32, i32
  }
  func.func @transform_3(%arg0: i32) -> (i32, i32) {
    %c0_i32 = arith.constant 0 : i32
    %c0_i32_0 = arith.constant 0 : i32
    %c0_i32_1 = arith.constant 0 : i32
    return %c0_i32, %c0_i32_0 : i32, i32
  }
  func.func @transform_4(%arg0: i32) -> (i32, i32) {
    %c0_i32 = arith.constant 0 : i32
    %c0_i32_0 = arith.constant 0 : i32
    %c0_i32_1 = arith.constant 0 : i32
    return %c0_i32, %c0_i32_0 : i32, i32
  }
  func.func @transform_5(%arg0: i32) -> (i32, i32) {
    %c0_i32 = arith.constant 0 : i32
    %c0_i32_0 = arith.constant 0 : i32
    %c0_i32_1 = arith.constant 0 : i32
    return %c0_i32, %c0_i32_0 : i32, i32
  }
  func.func @transform_6(%arg0: i32) -> (i32, i32) {
    %c0_i32 = arith.constant 0 : i32
    %c0_i32_0 = arith.constant 0 : i32
    %c0_i32_1 = arith.constant 0 : i32
    return %c0_i32, %c0_i32_0 : i32, i32
  }
  func.func @transform_7(%arg0: i32) -> (i32, i32) {
    %c0_i32 = arith.constant 0 : i32
    %c0_i32_0 = arith.constant 0 : i32
    %c0_i32_1 = arith.constant 0 : i32
    return %c0_i32, %c0_i32_0 : i32, i32
  }
  func.func @transform_8(%arg0: i32) -> (i32, i32, i32) {
    %c0_i32 = arith.constant 0 : i32
    %c0_i32_0 = arith.constant 0 : i32
    %c0_i32_1 = arith.constant 0 : i32
    return %arg0, %c0_i32, %c0_i32_0 : i32, i32, i32
  }
}

</mosaic_0001>

<bundles_post_ra>
// kernel: tpu_custom_call.1
= control target key start
LH: loop header
LB: loop body
LE: loop exit
PB: predicated region body
PF: predicated region fallthrough
CT: control target
= control target key end

     0   :  { %13 = vsyncpa [#allocation3], 0  ;;  %s2198_s0 = inlined_call_operand.vmem [shape: f32[2,8,32], index: 0, kind: input, shape index: {}]   ;;  %s2199_s1 = inlined_call_operand.vmem [shape: bf16[32,96], index: 1, kind: input, shape index: {}]   ;;  %s2200_s2 = inlined_call_operand.vmem [shape: f32[1,96], index: 2, kind: input, shape index: {}]   ;;  %s2201_s3 = inlined_call_operand.vmem [shape: bf16[32,32], index: 3, kind: input, shape index: {}]   ;;  %s2202_s4 = inlined_call_operand.hbm [shape: bf16[32,64], index: 4, kind: input, shape index: {}]   ;;  %s2203_s5 = inlined_call_operand.vmem [shape: bf16[64,32], index: 5, kind: input, shape index: {}]   ;;  %s2204_s6 = inlined_call_operand.vmem [shape: f32[1,64], index: 6, kind: input, shape index: {}]   ;;  %s2205_s7 = inlined_call_operand.vmem [shape: f32[6,32], index: 7, kind: input, shape index: {}]   ;;  %s2206_s8 = inlined_call_operand.hbm [shape: f32[2,8,32], index: 8, kind: output, shape index: {}]  }
   0x1   :  { %14 = vsyncpa [#allocation4], 0  ;;  %s1776_s27 = smov [#allocation2]   ;;  %s1728_s9 = scalar_lea.hbm %s2202_s4, 256 }
   0x2   :  { %s28_s28 = sshll.u32 %s1776_s27, 4  ;;  %p1729_p0 = scmp.ne.s32.totalorder %s2202_s4, %s1728_s9  ;;  %s29_s28 = int_to_ptr.vmem [resolvable:$true] %s28_s28 }
   0x3   :  { %p1732_p1 = scmp.lt.u32.totalorder %s1728_s9, %s2202_s4 }
   0x5   :  { %p1734_p2 = pnand %p1732_p1, %p1729_p0 }
   0x7   :  { %1737 = shalt.err (!%p1734_p2)
}
   0x8   :  { %s1738_s14 = scalar_lea.vmem %s29_s28, 256  ;;  %p1743_p4 = scmp.lt.s32.totalorder %s29_s28, %s29_s28 }
   0x9   :  { %p1739_p3 = scmp.ne.s32.totalorder %s29_s28, %s1738_s14  ;;  %p1744_p5 = scmp.lt.s32.totalorder %s1738_s14, %s1738_s14 }
   0xb   :  { %p1745_p6 = por %p1744_p5, %p1743_p4 }
   0xd   :  { %p1746_p7 = pnand %p1745_p6, %p1739_p3 }
   0xf   :  { %1749 = shalt.err (!%p1746_p7)
}
  0x10   :  { %s1777_s15 = smov 64   ;;  %s1778_s16 = smov 4  }
  0x11   :  { %34 = dma.hbm_to_vmem [thread:$0]  %s2202_s4, 256, %s29_s28, [#allocation3], %s1777_s15, %s1777_s15, %s1778_s16  }
  0x12   :  { %1772 = dma.done.wait [#allocation3], 256  }
  0x13   :  { %1773 = vsyncadd [#allocation3], 4294967040  ;;  %v1779_v0 = vmov 0.0   ;;  %vm1780_vm0 = vmmov 0   ;;  %v1678_v1 = vld [vmem:[%s2199_s1] sm:$0xff]   ;;  %v1679_v2 = vld [vmem:[%s2199_s1 + $0x8] sm:$0xff]  }
  0x14   :  { %1517 = vmatprep.subr.bf16.mxu0 %v1779_v0  ;;  %1521 = vmatprep.mubr.msk.bf16.mxu0 %vm1780_vm0, %v1779_v0  ;;  %v1864_v3 = vld [vmem:[%s2198_s0] sm:$0xff]  ;;  %v1869_v4 = vld [vmem:[%s2198_s0 + $0x8] sm:$0xff]  ;;  %vm71_vm1 = vcmask 261120   ;;  %s1781_s0 = smov 112   ;;  %s1782_s27 = smov 120   ;;  %vm136_vm2 = vcmask 64512  }
  0x15   :  { %1525 = vmatprep.subr.bf16.mxu1 %v1779_v0  ;;  %1527 = vmatprep.mubr.msk.bf16.mxu1 %vm1780_vm0, %v1779_v0  ;;  %v47_v5 = vpack.c.bf16 %v1869_v4, %v1864_v3  ;;  %v1423_v6 = vld [vmem:[%s2200_s2] ss:$0 sm:$0xff]  ;;  %s1783_s2 = smov 104   ;;  %s1784_s28 = smov 96   ;;  %vm688_vm10 = vcmask 1043456  }
  0x16   :  { %1518 = vmatpush3.bf16.msra.mxu0 %v1678_v1  ;;  %s1785_s29 = smov 8   ;;  %s1786_s12 = smov 16  }
  0x17   :  { %1519 = vmatprep.subr.bf16.mxu0 %v1779_v0  ;;  %s1787_s13 = smov 24   ;;  %s1788_s30 = smov [#allocation5]  }
  0x18   :  { %s1411_s9 = sshll.u32 %s1788_s30, 4  ;;  %s1412_s9 = int_to_ptr.vmem [resolvable:$true] %s1411_s9 }
  0x19   :  { %s1750_s10 = scalar_lea.vmem %s1412_s9, 256  ;;  %p1755_p9 = scmp.lt.s32.totalorder %s1412_s9, %s1412_s9 }
  0x1a   :  { %1520 = vmatpush3.bf16.msra.mxu0 %v1679_v2  ;;  %p1751_p8 = scmp.ne.s32.totalorder %s1412_s9, %s1750_s10  ;;  %p1756_p10 = scmp.lt.s32.totalorder %s1750_s10, %s1750_s10 }
  0x1b   :  { %1531 = vmatprep.subr.bf16.mxu0 %v1779_v0 }
  0x1c   :  { %p1757_p11 = por %p1756_p10, %p1755_p9 }
  0x1d   :  { %1522 = vmatmul.mubr.msk.bf16.vlgmr.msra.gmra.mrb[0].mxu0 %vm71_vm1, %v47_v5 }
  0x1e   :  { %1533 = vmatprep.mubr.msk.bf16.mxu0 %vm1780_vm0, %v1779_v0  ;;  %p1758_p12 = pnand %p1757_p11, %p1751_p8 }
  0xf0   :  { %v109_v7 = vpop.f32.mrb[0].mxu0 }
  0xf1   :  { %v110_v8 = vadd.f32 %v1423_v6, %v109_v7  ;;  %v1523_v9 = vpop.f32.mrb[1].mxu0 }
  0xf2   :  { %v112_v10 = vpop.f32.mrb[2].mxu0 }
  0xf3   :  { %v1881_v11 = vpack.c.bf16 %v110_v8, %v110_v8  ;;  %v113_v12 = vadd.f32 %v1423_v6, %v112_v10  ;;  %v1524_v13 = vpop.f32.mrb[3].mxu0 }
  0xf5   :  { %126 = vrot.lane.b32.xlu1 %v1881_v11, %s1781_s0  ;;  %122 = vrot.lane.b32.xlu0 %v1881_v11, %s1782_s27  ;;  %v1885_v14 = vpack.c.bf16 %v113_v12, %v113_v12 }
  0xf9   :  { %128 = vrot.lane.b32.xlu1 %v1885_v14, %s1781_s0  ;;  %124 = vrot.lane.b32.xlu0 %v1885_v14, %s1782_s27 }
  0xfd   :  { %132 = vrot.lane.b32.xlu1 %v1885_v14, %s1783_s2  ;;  %130 = vrot.lane.b32.xlu0 %v1881_v11, %s1783_s2 }
 0x101   :  { %183 = vrot.lane.b32.xlu1 %v1885_v14, %s1784_s28  ;;  %134 = vrot.lane.b32.xlu0 %v1881_v11, %s1784_s28 }
 0x167   :  { %v127_v15 = vpop.permute.xlu1 %126  ;;  %v123_v16 = vpop.permute.xlu0 %122 }
 0x168   :  { %v1893_v17 = vcombine.low %v123_v16, %v123_v16  ;;  %v1896_v20 = vcombine.low %v127_v15, %v127_v15 }
 0x16a   :  { %233 = vrot.lane.b32.xlu0 %v1893_v17, %s1784_s28 }
 0x16b   :  { %v129_v18 = vpop.permute.xlu1 %128  ;;  %v125_v19 = vpop.permute.xlu0 %124 }
 0x16c   :  { %v1898_v21 = vcombine.low %v125_v19, %v125_v19  ;;  %v1902_v24 = vcombine.low %v129_v18, %v129_v18 }
 0x16e   :  { %333 = vrot.lane.b32.xlu0 %v1896_v20, %s1784_s28  ;;  %283 = vrot.lane.b32.xlu1 %v1898_v21, %s1784_s28 }
 0x16f   :  { %v133_v22 = vpop.permute.xlu1 %132  ;;  %v131_v23 = vpop.permute.xlu0 %130 }
 0x170   :  { %v1904_v25 = vcombine.low %v131_v23, %v131_v23  ;;  %v1908_v28 = vcombine.low %v133_v22, %v133_v22 }
 0x172   :  { %383 = vrot.lane.b32.xlu1 %v1902_v24, %s1784_s28  ;;  %433 = vrot.lane.b32.xlu0 %v1904_v25, %s1784_s28 }
 0x173   :  { %v184_v26 = vpop.permute.xlu1 %183  ;;  %v135_v27 = vpop.permute.xlu0 %134 }
 0x174   :  { %v189_v29 = vsel %vm136_vm2, %v184_v26, 0  ;;  %v141_v30 = vsel %vm136_vm2, %v135_v27, 0 }
 0x175   :  { %1526 = vmatpush3.bf16.xpose.msra.mxu1 %v141_v30  ;;  %1532 = vmatpush3.bf16.xpose.msra.mxu0 %v189_v29 }
 0x176   :  { %483 = vrot.lane.b32.xlu1 %v1908_v28, %s1784_s28  ;;  %1537 = vmatprep.subr.bf16.mxu1 %v1779_v0 }
 0x177   :  { %1543 = vmatprep.subr.bf16.mxu0 %v1779_v0 }
 0x17c   :  { %1528 = vmatmul.mubr.msk.bf16.vlgmr.msra.gmra.mrb[0].mxu1 %vm136_vm2, %v1881_v11  ;;  %1534 = vmatmul.mubr.msk.bf16.vlgmr.msra.gmra.mrb[4].mxu0 %vm136_vm2, %v1885_v14 }
 0x17d   :  { %1539 = vmatprep.mubr.msk.bf16.mxu1 %vm1780_vm0, %v1779_v0  ;;  %1545 = vmatprep.mubr.msk.bf16.mxu0 %vm1780_vm0, %v1779_v0 }
 0x1dc   :  { %v234_v31 = vpop.permute.xlu0 %233 }
 0x1dd   :  { %v239_v32 = vsel %vm136_vm2, %v234_v31, 0 }
 0x1de   :  { %1538 = vmatpush3.bf16.xpose.msra.mxu1 %v239_v32 }
 0x1df   :  { %1549 = vmatprep.subr.bf16.mxu1 %v1779_v0 }
 0x1e0   :  { %v284_v33 = vpop.permute.xlu1 %283  ;;  %v334_v35 = vpop.permute.xlu0 %333 }
 0x1e1   :  { %v289_v34 = vsel %vm136_vm2, %v284_v33, 0  ;;  %v339_v36 = vsel %vm136_vm2, %v334_v35, 0 }
 0x1e2   :  { %1544 = vmatpush3.bf16.xpose.msra.mxu0 %v289_v34 }
 0x1e3   :  { %1555 = vmatprep.subr.bf16.mxu0 %v1779_v0 }
 0x1e4   :  { %v384_v37 = vpop.permute.xlu1 %383  ;;  %v434_v39 = vpop.permute.xlu0 %433 }
 0x1e5   :  { %1540 = vmatmul.mubr.msk.bf16.vlgmr.msra.gmra.mrb[4].mxu1 %vm136_vm2, %v123_v16  ;;  %v389_v38 = vsel %vm136_vm2, %v384_v37, 0  ;;  %v439_v40 = vsel %vm136_vm2, %v434_v39, 0 }
 0x1e6   :  { %1550 = vmatpush3.bf16.xpose.msra.mxu1 %v339_v36  ;;  %1551 = vmatprep.mubr.msk.bf16.mxu1 %vm1780_vm0, %v1779_v0 }
 0x1e7   :  { %1561 = vmatprep.subr.bf16.mxu1 %v1779_v0 }
 0x1e8   :  { %v484_v41 = vpop.permute.xlu1 %483 }
 0x1e9   :  { %1546 = vmatmul.mubr.msk.bf16.vlgmr.msra.gmra.mrb[8].mxu0 %vm136_vm2, %v125_v19  ;;  %v489_v42 = vsel %vm136_vm2, %v484_v41, 0 }
 0x1ea   :  { %1556 = vmatpush3.bf16.xpose.msra.mxu0 %v389_v38  ;;  %1557 = vmatprep.mubr.msk.bf16.mxu0 %vm1780_vm0, %v1779_v0 }
 0x1eb   :  { %1567 = vmatprep.subr.bf16.mxu0 %v1779_v0 }
 0x1ed   :  { %1552 = vmatmul.mubr.msk.bf16.vlgmr.msra.gmra.mrb[8].mxu1 %vm136_vm2, %v127_v15 }
 0x1ee   :  { %1562 = vmatpush3.bf16.xpose.msra.mxu1 %v439_v40  ;;  %1563 = vmatprep.mubr.msk.bf16.mxu1 %vm1780_vm0, %v1779_v0 }
 0x1ef   :  { %1573 = vmatprep.subr.bf16.mxu1 %v1779_v0 }
 0x1f1   :  { %1558 = vmatmul.mubr.msk.bf16.vlgmr.msra.gmra.mrb[12].mxu0 %vm136_vm2, %v129_v18 }
 0x1f2   :  { %1568 = vmatpush3.bf16.xpose.msra.mxu0 %v489_v42  ;;  %1569 = vmatprep.mubr.msk.bf16.mxu0 %vm1780_vm0, %v1779_v0 }
 0x1f3   :  { %1579 = vmatprep.subr.bf16.mxu0 %v1779_v0 }
 0x1f5   :  { %1564 = vmatmul.mubr.msk.bf16.vlgmr.msra.gmra.mrb[12].mxu1 %vm136_vm2, %v131_v23 }
 0x1f6   :  { %1575 = vmatprep.mubr.msk.bf16.mxu1 %vm1780_vm0, %v1779_v0 }
 0x1f9   :  { %1570 = vmatmul.mubr.msk.bf16.vlgmr.msra.gmra.mrb[16].mxu0 %vm136_vm2, %v133_v22 }
 0x1fa   :  { %1581 = vmatprep.mubr.msk.bf16.mxu0 %vm1780_vm0, %v1779_v0 }
 0x24f   :  { %v1953_v43 = vpop.f32.mrb[0].mxu1  ;;  %v1955_v44 = vpop.f32.mrb[4].mxu0 }
 0x250   :  { %v1529_v45 = vpop.f32.mrb[1].mxu1  ;;  %v1535_v46 = vpop.f32.mrb[5].mxu0  ;;  %v531_v47 = vsel %vm136_vm2, %v1953_v43, -inf  ;;  %v534_v48 = vsel %vm136_vm2, %v1955_v44, -inf }
 0x251   :  { %532 = vmax.xlane.f32.xlu0 %v531_v47  ;;  %v180_v49 = vpop.f32.mrb[2].mxu1  ;;  %535 = vmax.xlane.f32.xlu1 %v534_v48  ;;  %v228_v50 = vpop.f32.mrb[6].mxu0 }
 0x252   :  { %v1530_v51 = vpop.f32.mrb[3].mxu1  ;;  %v1536_v52 = vpop.f32.mrb[7].mxu0 }
 0x2b8   :  { %v1961_v53 = vpop.f32.mrb[4].mxu1 }
 0x2b9   :  { %v1541_v54 = vpop.f32.mrb[5].mxu1  ;;  %v537_v55 = vsel %vm136_vm2, %v1961_v53, -inf }
 0x2ba   :  { %538 = vmax.xlane.f32.xlu0 %v537_v55  ;;  %v278_v56 = vpop.f32.mrb[6].mxu1 }
 0x2bb   :  { %v1542_v57 = vpop.f32.mrb[7].mxu1 }
 0x2bc   :  { %v1965_v58 = vpop.f32.mrb[8].mxu0 }
 0x2bd   :  { %v1547_v59 = vpop.f32.mrb[9].mxu0  ;;  %v540_v60 = vsel %vm136_vm2, %v1965_v58, -inf }
 0x2be   :  { %541 = vmax.xlane.f32.xlu0 %v540_v60  ;;  %v328_v61 = vpop.f32.mrb[10].mxu0 }
 0x2bf   :  { %v1548_v62 = vpop.f32.mrb[11].mxu0 }
 0x2c0   :  { %v1969_v63 = vpop.f32.mrb[8].mxu1 }
 0x2c1   :  { %v1553_v1 = vpop.f32.mrb[9].mxu1  ;;  %v543_v2 = vsel %vm136_vm2, %v1969_v63, -inf }
 0x2c2   :  { %v378_v5 = vpop.f32.mrb[10].mxu1  ;;  %544 = vmax.xlane.f32.xlu1 %v543_v2 }
 0x2c3   :  { %v1554_v6 = vpop.f32.mrb[11].mxu1 }
 0x2c4   :  { %v1973_v7 = vpop.f32.mrb[12].mxu0 }
 0x2c5   :  { %v1559_v8 = vpop.f32.mrb[13].mxu0  ;;  %v546_v9 = vsel %vm136_vm2, %v1973_v7, -inf }
 0x2c6   :  { %547 = vmax.xlane.f32.xlu0 %v546_v9  ;;  %v428_v10 = vpop.f32.mrb[14].mxu0 }
 0x2c7   :  { %v1560_v12 = vpop.f32.mrb[15].mxu0 }
 0x2c8   :  { %v1977_v13 = vpop.f32.mrb[12].mxu1 }
 0x2c9   :  { %v1565_v15 = vpop.f32.mrb[13].mxu1  ;;  %v549_v16 = vsel %vm136_vm2, %v1977_v13, -inf }
 0x2ca   :  { %v478_v18 = vpop.f32.mrb[14].mxu1  ;;  %550 = vmax.xlane.f32.xlu1 %v549_v16 }
 0x2cb   :  { %v1566_v19 = vpop.f32.mrb[15].mxu1 }
 0x2cc   :  { %v1981_v22 = vpop.f32.mrb[16].mxu0 }
 0x2cd   :  { %v1571_v23 = vpop.f32.mrb[17].mxu0  ;;  %v552_v26 = vsel %vm136_vm2, %v1981_v22, -inf }
 0x2ce   :  { %553 = vmax.xlane.f32.xlu0 %v552_v26  ;;  %v528_v27 = vpop.f32.mrb[18].mxu0 }
 0x2cf   :  { %v1572_v29 = vpop.f32.mrb[19].mxu0 }
 0x2db   :  { %683 = vrot.lane.b32.xlu1 %v1881_v11, %s1777_s15 }
 0x2de   :  { %v536_v30 = vpop.xlane.xlu1 %535  ;;  %v533_v33 = vpop.xlane.xlu0 %532 }
 0x2df   :  { %vm556_vm3 = vcmp.lt.f32.partialorder %v1955_v44, %v536_v30  ;;  %vm555_vm4 = vcmp.lt.f32.partialorder %v1953_v43, %v533_v33  ;;  %v603_v5 = vsub.f32 %v1953_v43, %v533_v33  ;;  %v604_v6 = vsub.f32 %v1955_v44, %v536_v30 }
 0x2e0   :  { %v564_v31 = vsel %vm556_vm3, %v1955_v44, -1e+30  ;;  %v563_v34 = vsel %vm555_vm4, %v1953_v43, -1e+30 }
 0x2e1   :  { %v574_v32 = vsel %vm136_vm2, %v564_v31, -inf  ;;  %v571_v35 = vsel %vm136_vm2, %v563_v34, -inf  ;;  %v611_v8 = vmul.f32 1.442695, %v603_v5  ;;  %v613_v9 = vmul.f32 1.442695, %v604_v6 }
 0x2e2   :  { %575 = vmax.xlane.f32.xlu0 %v574_v32 }
 0x2e3   :  { %1688 = vpow2.f32 %v611_v8 }
 0x2e4   :  { %1690 = vpow2.f32 %v613_v9 }
 0x2ff   :  { %572 = vmax.xlane.f32.xlu1 %v571_v35 }
 0x347   :  { %v539_v36 = vpop.xlane.xlu0 %538 }
 0x348   :  { %vm557_vm5 = vcmp.lt.f32.partialorder %v1961_v53, %v539_v36  ;;  %v605_v11 = vsub.f32 %v1961_v53, %v539_v36 }
 0x349   :  { %v565_v37 = vsel %vm557_vm5, %v1961_v53, -1e+30 }
 0x34a   :  { %v577_v38 = vsel %vm136_vm2, %v565_v37, -inf  ;;  %v615_v19 = vmul.f32 1.442695, %v605_v11 }
 0x34b   :  { %578 = vmax.xlane.f32.xlu1 %v577_v38  ;;  %v542_v39 = vpop.xlane.xlu0 %541 }
 0x34c   :  { %vm558_vm6 = vcmp.lt.f32.partialorder %v1965_v58, %v542_v39  ;;  %v606_v40 = vsub.f32 %v1965_v58, %v542_v39  ;;  %1692 = vpow2.f32 %v615_v19 }
 0x34d   :  { %v566_v41 = vsel %vm558_vm6, %v1965_v58, -1e+30 }
 0x34e   :  { %v580_v42 = vsel %vm136_vm2, %v566_v41, -inf  ;;  %v617_v23 = vmul.f32 1.442695, %v606_v40 }
 0x34f   :  { %v545_v45 = vpop.xlane.xlu1 %544  ;;  %581 = vmax.xlane.f32.xlu0 %v580_v42 }
 0x350   :  { %vm559_vm7 = vcmp.lt.f32.partialorder %v1969_v63, %v545_v45  ;;  %v607_v46 = vsub.f32 %v1969_v63, %v545_v45  ;;  %1694 = vpow2.f32 %v617_v23 }
 0x351   :  { %v567_v47 = vsel %vm559_vm7, %v1969_v63, -1e+30  ;;  %vm1094_vm7 = vcmask 130048  }
 0x352   :  { %v583_v48 = vsel %vm136_vm2, %v567_v47, -inf }
 0x353   :  { %584 = vmax.xlane.f32.xlu1 %v583_v48  ;;  %v548_v49 = vpop.xlane.xlu0 %547 }
 0x354   :  { %vm560_vm8 = vcmp.lt.f32.partialorder %v1973_v7, %v548_v49  ;;  %v608_v50 = vsub.f32 %v1973_v7, %v548_v49 }
 0x355   :  { %v568_v51 = vsel %vm560_vm8, %v1973_v7, -1e+30  ;;  %vm1097_vm8 = vcmask 195584  }
 0x356   :  { %v586_v52 = vsel %vm136_vm2, %v568_v51, -inf }
 0x357   :  { %v551_v54 = vpop.xlane.xlu1 %550  ;;  %587 = vmax.xlane.f32.xlu0 %v586_v52 }
 0x358   :  { %vm561_vm9 = vcmp.lt.f32.partialorder %v1977_v13, %v551_v54  ;;  %v609_v55 = vsub.f32 %v1977_v13, %v551_v54 }
 0x359   :  { %v569_v56 = vsel %vm561_vm9, %v1977_v13, -1e+30 }
 0x35a   :  { %v589_v57 = vsel %vm136_vm2, %v569_v56, -inf  ;;  %v623_v30 = vmul.f32 1.442695, %v609_v55 }
 0x35b   :  { %590 = vmax.xlane.f32.xlu1 %v589_v57  ;;  %v684_v59 = vpop.permute.xlu1 %683  ;;  %v554_v60 = vpop.xlane.xlu0 %553 }
 0x35c   :  { %v690_v61 = vsel %vm688_vm10, %v684_v59, 0  ;;  %vm562_vm11 = vcmp.lt.f32.partialorder %v1981_v22, %v554_v60  ;;  %v610_v62 = vsub.f32 %v1981_v22, %v554_v60 }
 0x35d   :  { %1574 = vmatpush3.bf16.msra.mxu1 %v690_v61  ;;  %v570_v1 = vsel %vm562_vm11, %v1981_v22, -1e+30 }
 0x35e   :  { %v592_v2 = vsel %vm136_vm2, %v570_v1, -inf  ;;  %1585 = vmatprep.subr.bf16.mxu1 %v1779_v0  ;;  %v625_v35 = vmul.f32 1.442695, %v610_v62 }
 0x35f   :  { %593 = vmax.xlane.f32.xlu0 %v592_v2 }
 0x36c   :  { %780 = vrot.lane.b32.xlu1 %v1893_v17, %s1777_s15  ;;  %v1689_v17 = vpop.eup %1688 }
 0x36d   :  { %v1691_v15 = vpop.eup %1690 }
 0x36e   :  { %v1693_v27 = vpop.eup %1692 }
 0x36f   :  { %v576_v10 = vpop.xlane.xlu0 %575  ;;  %v1695_v33 = vpop.eup %1694 }
 0x370   :  { %828 = vrot.lane.b32.xlu1 %v1898_v21, %s1777_s15  ;;  %vm596_vm12 = vcmp.lt.f32.partialorder %v1955_v44, %v576_v10  ;;  %v619_v44 = vmul.f32 1.442695, %v607_v46 }
 0x371   :  { %v2031_v16 = vsel %vm596_vm12, 0.0, %v1691_v15 }
 0x372   :  { %v638_v18 = vsel %vm136_vm2, %v2031_v16, 0.0  ;;  %1696 = vpow2.f32 %v619_v44 }
 0x375   :  { %732 = vrot.lane.b32.xlu0 %v1885_v14, %s1777_s15 }
 0x37c   :  { %v1697_v11 = vpop.eup %1696 }
 0x38c   :  { %v573_v12 = vpop.xlane.xlu1 %572 }
 0x38d   :  { %vm595_vm13 = vcmp.lt.f32.partialorder %v1953_v43, %v573_v12  ;;  %v621_v43 = vmul.f32 1.442695, %v608_v50 }
 0x38e   :  { %v2029_v21 = vsel %vm595_vm13, 0.0, %v1689_v17 }
 0x38f   :  { %v635_v14 = vsel %vm136_vm2, %v2029_v21, 0.0  ;;  %1698 = vpow2.f32 %v621_v43 }
 0x390   :  { %1700 = vpow2.f32 %v623_v30 }
 0x391   :  { %1702 = vpow2.f32 %v625_v35 }
 0x394   :  { %636 = vadd.xlane.f32.xlu1 %v635_v14  ;;  %639 = vadd.xlane.f32.xlu0 %v638_v18 }
 0x399   :  { %v1699_v39 = vpop.eup %1698 }
 0x39a   :  { %v1701_v41 = vpop.eup %1700 }
 0x39b   :  { %v1703_v46 = vpop.eup %1702 }
 0x3d8   :  { %v579_v26 = vpop.xlane.xlu1 %578 }
 0x3d9   :  { %vm597_vm14 = vcmp.lt.f32.partialorder %v1961_v53, %v579_v26 }
 0x3da   :  { %v2038_v29 = vsel %vm597_vm14, 0.0, %v1693_v27 }
 0x3db   :  { %v641_v31 = vsel %vm136_vm2, %v2038_v29, 0.0 }
 0x3dc   :  { %642 = vadd.xlane.f32.xlu1 %v641_v31  ;;  %v582_v32 = vpop.xlane.xlu0 %581 }
 0x3dd   :  { %vm598_vm15 = vcmp.lt.f32.partialorder %v1965_v58, %v582_v32 }
 0x3de   :  { %v2043_v34 = vsel %vm598_vm15, 0.0, %v1695_v33 }
 0x3df   :  { %v644_v36 = vsel %vm136_vm2, %v2043_v34, 0.0 }
 0x3e0   :  { %v585_v53 = vpop.xlane.xlu1 %584  ;;  %645 = vadd.xlane.f32.xlu0 %v644_v36 }
 0x3e1   :  { %vm599_vm3 = vcmp.lt.f32.partialorder %v1969_v63, %v585_v53 }
 0x3e2   :  { %v2048_v37 = vsel %vm599_vm3, 0.0, %v1697_v11 }
 0x3e4   :  { %v588_v38 = vpop.xlane.xlu0 %587 }
 0x3e5   :  { %vm600_vm4 = vcmp.lt.f32.partialorder %v1973_v7, %v588_v38 }
 0x3e6   :  { %v2051_v58 = vsel %vm600_vm4, 0.0, %v1699_v39 }
 0x3e8   :  { %v591_v40 = vpop.xlane.xlu1 %590 }
 0x3e9   :  { %vm601_vm5 = vcmp.lt.f32.partialorder %v1977_v13, %v591_v40  ;;  %v647_v13 = vsel %vm136_vm2, %v2048_v37, 0.0 }
 0x3ea   :  { %v2054_v42 = vsel %vm601_vm5, 0.0, %v1701_v41 }
 0x3ec   :  { %v594_v45 = vpop.xlane.xlu0 %593  ;;  %v781_v48 = vpop.permute.xlu1 %780 }
 0x3ed   :  { %vm602_vm6 = vcmp.lt.f32.partialorder %v1981_v22, %v594_v45  ;;  %924 = vrot.lane.b32.xlu1 %v1902_v24, %s1777_s15  ;;  %v653_v22 = vsel %vm136_vm2, %v2054_v42, 0.0  ;;  %v650_v24 = vsel %vm136_vm2, %v2051_v58, 0.0  ;;  %v786_v60 = vsel %vm688_vm10, %v781_v48, 0 }
 0x3ee   :  { %v2059_v63 = vsel %vm602_vm6, 0.0, %v1703_v46 }
 0x3ef   :  { %v656_v49 = vsel %vm136_vm2, %v2059_v63, 0.0 }
 0x3f0   :  { %v733_v47 = vpop.permute.xlu0 %732  ;;  %v829_v50 = vpop.permute.xlu1 %828 }
 0x3f1   :  { %v738_v7 = vsel %vm688_vm10, %v733_v47, 0  ;;  %v834_v61 = vsel %vm688_vm10, %v829_v50, 0 }
 0x3f2   :  { %1580 = vmatpush3.bf16.msra.mxu0 %v738_v7 }
 0x3f3   :  { %1591 = vmatprep.subr.bf16.mxu0 %v1779_v0 }
 0x3f6   :  { %876 = vrot.lane.b32.xlu0 %v1896_v20, %s1777_s15 }
 0x411   :  { %648 = vadd.xlane.f32.xlu1 %v647_v13 }
 0x415   :  { %654 = vadd.xlane.f32.xlu1 %v653_v22  ;;  %651 = vadd.xlane.f32.xlu0 %v650_v24 }
 0x419   :  { %657 = vadd.xlane.f32.xlu0 %v656_v49  ;;  %v1680_v49 = vld [vmem:[%s2201_s3] sm:$0xff]  }
 0x421   :  { %v637_v51 = vpop.xlane.xlu1 %636  ;;  %v640_v20 = vpop.xlane.xlu0 %639 }
 0x422   :  { %1704 = vrcp.f32 %v637_v51 }
 0x423   :  { %1706 = vrcp.f32 %v640_v20 }
 0x426   :  { %1020 = vrot.lane.b32.xlu1 %v1908_v28, %s1777_s15 }
 0x42c   :  { %v1705_v52 = vpop.eup %1704 }
 0x42d   :  { %v1707_v54 = vpop.eup %1706  ;;  %v667_v55 = vmul.f32 %v1705_v52, %v2029_v21 }
 0x42e   :  { %v668_v56 = vmul.f32 %v1707_v54, %v2031_v16  ;;  %v1681_v54 = vld [vmem:[%s2201_s3 + $0x8] sm:$0xff]  }
 0x42f   :  { %972 = vrot.lane.b32.xlu0 %v1904_v25, %s1777_s15  ;;  %v675_v57 = vpack.c.bf16 %v667_v55, %v667_v55 }
 0x430   :  { %v676_v59 = vpack.c.bf16 %v668_v56, %v668_v56 }
 0x431   :  { %1576 = vmatmul.mubr.msk.bf16.vlgmr.msra.gmra.mrb[16].mxu1 %vm136_vm2, %v675_v57 }
 0x432   :  { %1582 = vmatmul.mubr.msk.bf16.vlgmr.msra.gmra.mrb[20].mxu0 %vm136_vm2, %v676_v59  ;;  %1586 = vmatpush3.bf16.msra.mxu1 %v786_v60 }
 0x433   :  { %1592 = vmatpush3.bf16.msra.mxu0 %v834_v61  ;;  %1587 = vmatprep.mubr.msk.bf16.mxu1 %vm1780_vm0, %v1779_v0 }
 0x434   :  { %1597 = vmatprep.subr.bf16.mxu1 %v1779_v0  ;;  %1593 = vmatprep.mubr.msk.bf16.mxu0 %vm1780_vm0, %v1779_v0 }
 0x435   :  { %1603 = vmatprep.subr.bf16.mxu0 %v1779_v0 }
 0x469   :  { %v643_v25 = vpop.xlane.xlu1 %642 }
 0x46a   :  { %1708 = vrcp.f32 %v643_v25 }
 0x46d   :  { %v646_v28 = vpop.xlane.xlu0 %645  ;;  %v925_v10 = vpop.permute.xlu1 %924 }
 0x46e   :  { %1710 = vrcp.f32 %v646_v28  ;;  %v930_v17 = vsel %vm688_vm10, %v925_v10, 0 }
 0x471   :  { %v877_v2 = vpop.permute.xlu0 %876 }
 0x472   :  { %v882_v9 = vsel %vm688_vm10, %v877_v2, 0 }
 0x474   :  { %v1709_v62 = vpop.eup %1708 }
 0x475   :  { %v669_v1 = vmul.f32 %v1709_v62, %v2038_v29 }
 0x477   :  { %v677_v5 = vpack.c.bf16 %v669_v1, %v669_v1 }
 0x478   :  { %v1711_v6 = vpop.eup %1710 }
 0x479   :  { %v670_v8 = vmul.f32 %v1711_v6, %v2043_v34  ;;  %1588 = vmatmul.mubr.msk.bf16.vlgmr.msra.gmra.mrb[20].mxu1 %vm136_vm2, %v677_v5 }
 0x47a   :  { %1598 = vmatpush3.bf16.msra.mxu1 %v882_v9  ;;  %1599 = vmatprep.mubr.msk.bf16.mxu1 %vm1780_vm0, %v1779_v0 }
 0x47b   :  { %v678_v12 = vpack.c.bf16 %v670_v8, %v670_v8  ;;  %1609 = vmatprep.subr.bf16.mxu1 %v1779_v0 }
 0x47d   :  { %1594 = vmatmul.mubr.msk.bf16.vlgmr.msra.gmra.mrb[24].mxu0 %vm136_vm2, %v678_v12 }
 0x47e   :  { %1604 = vmatpush3.bf16.msra.mxu0 %v930_v17  ;;  %1605 = vmatprep.mubr.msk.bf16.mxu0 %vm1780_vm0, %v1779_v0 }
 0x47f   :  { %1615 = vmatprep.subr.bf16.mxu0 %v1779_v0 }
 0x49e   :  { %v649_v15 = vpop.xlane.xlu1 %648 }
 0x49f   :  { %1712 = vrcp.f32 %v649_v15 }
 0x4a2   :  { %v655_v21 = vpop.xlane.xlu1 %654  ;;  %v652_v16 = vpop.xlane.xlu0 %651 }
 0x4a3   :  { %1714 = vrcp.f32 %v655_v21 }
 0x4a4   :  { %1716 = vrcp.f32 %v652_v16 }
 0x4a6   :  { %v658_v14 = vpop.xlane.xlu0 %657  ;;  %v1021_v31 = vpop.permute.xlu1 %1020 }
 0x4a7   :  { %1718 = vrcp.f32 %v658_v14  ;;  %v1026_v34 = vsel %vm688_vm10, %v1021_v31, 0 }
 0x4a9   :  { %v1713_v18 = vpop.eup %1712 }
 0x4aa   :  { %v671_v19 = vmul.f32 %v1713_v18, %v2048_v37  ;;  %v973_v23 = vpop.permute.xlu0 %972 }
 0x4ab   :  { %v978_v27 = vsel %vm688_vm10, %v973_v23, 0 }
 0x4ac   :  { %v679_v44 = vpack.c.bf16 %v671_v19, %v671_v19 }
 0x4ad   :  { %v1715_v43 = vpop.eup %1714 }
 0x4ae   :  { %v1717_v26 = vpop.eup %1716  ;;  %1600 = vmatmul.mubr.msk.bf16.vlgmr.msra.gmra.mrb[24].mxu1 %vm136_vm2, %v679_v44  ;;  %v673_v30 = vmul.f32 %v1715_v43, %v2054_v42 }
 0x4af   :  { %v672_v29 = vmul.f32 %v1717_v26, %v2051_v58  ;;  %1610 = vmatpush3.bf16.msra.mxu1 %v978_v27  ;;  %1611 = vmatprep.mubr.msk.bf16.mxu1 %vm1780_vm0, %v1779_v0 }
 0x4b0   :  { %1621 = vmatprep.subr.bf16.mxu1 %v1779_v0  ;;  %v681_v35 = vpack.c.bf16 %v673_v30, %v673_v30  ;;  %v1451_v30 = vld [vmem:[%s2205_s7] ss:$0 sm:$0xff] }
 0x4b1   :  { %v680_v32 = vpack.c.bf16 %v672_v29, %v672_v29  ;;  %v1719_v33 = vpop.eup %1718 }
 0x4b2   :  { %v674_v36 = vmul.f32 %v1719_v33, %v2059_v63 }
 0x4b3   :  { %1606 = vmatmul.mubr.msk.bf16.vlgmr.msra.gmra.mrb[28].mxu0 %vm136_vm2, %v680_v32 }
 0x4b4   :  { %1616 = vmatpush3.bf16.msra.mxu0 %v1026_v34  ;;  %1617 = vmatprep.mubr.msk.bf16.mxu0 %vm1780_vm0, %v1779_v0  ;;  %v682_v53 = vpack.c.bf16 %v674_v36, %v674_v36 }
 0x4b5   :  { %1629 = vmatprep.subr.bf16.mxu0 %v1779_v0 }
 0x4b6   :  { %1612 = vmatmul.mubr.msk.bf16.vlgmr.msra.gmra.mrb[28].mxu1 %vm136_vm2, %v681_v35 }
 0x4b7   :  { %1625 = vmatprep.mubr.msk.bf16.mxu1 %vm1780_vm0, %v1779_v0  ;;  %1622 = vmatpush3.bf16.msra.mxu1 %v1680_v49 }
 0x4b8   :  { %1623 = vmatprep.subr.bf16.mxu1 %v1779_v0 }
 0x4bb   :  { %1618 = vmatmul.mubr.msk.bf16.vlgmr.msra.gmra.mrb[32].mxu0 %vm136_vm2, %v682_v53  ;;  %1624 = vmatpush3.bf16.msra.mxu1 %v1681_v54  ;;  %v1455_v54 = vld [vmem:[%s2205_s7 + $0x1] ss:$0 sm:$0xff] }
 0x4bc   :  { %1633 = vmatprep.mubr.msk.bf16.mxu0 %vm1780_vm0, %v1779_v0  ;;  %1637 = vmatprep.subr.bf16.mxu1 %v1779_v0 }
 0x504   :  { %v726_v11 = vpop.f32.mrb[16].mxu1 }
 0x505   :  { %v774_v37 = vpop.f32.mrb[20].mxu0  ;;  %v1577_v38 = vpop.f32.mrb[17].mxu1 }
 0x506   :  { %v1583_v39 = vpop.f32.mrb[21].mxu0  ;;  %v729_v58 = vpop.f32.mrb[18].mxu1 }
 0x507   :  { %v777_v40 = vpop.f32.mrb[22].mxu0  ;;  %v1578_v41 = vpop.f32.mrb[19].mxu1 }
 0x508   :  { %v1584_v42 = vpop.f32.mrb[23].mxu0 }
 0x54c   :  { %v822_v45 = vpop.f32.mrb[20].mxu1 }
 0x54d   :  { %v1589_v46 = vpop.f32.mrb[21].mxu1 }
 0x54e   :  { %v825_v63 = vpop.f32.mrb[22].mxu1 }
 0x54f   :  { %v1590_v47 = vpop.f32.mrb[23].mxu1 }
 0x550   :  { %v870_v7 = vpop.f32.mrb[24].mxu0 }
 0x551   :  { %v1663_v13 = vpack.i.bf16 %v870_v7, %v822_v45  ;;  %v1595_v22 = vpop.f32.mrb[25].mxu0  ;;  %v1682_v7 = vld [vmem:[#allocation2] sm:$0xff]  }
 0x552   :  { %v873_v24 = vpop.f32.mrb[26].mxu0  ;;  %1630 = vmatpush3.bf16.msra.mxu0 %v1682_v7  ;;  %v1685_v22 = vld [vmem:[%s2203_s5 + $0x8] sm:$0xff]   ;;  %v1468_v7 = vld [vmem:[%s2205_s7 + $0x5] ss:$0 sm:$0xff] }
 0x553   :  { %1664 = vrot.lane.b32.xlu0 %v1663_v13, %s1785_s29  ;;  %v1596_v48 = vpop.f32.mrb[27].mxu0  ;;  %1631 = vmatprep.subr.bf16.mxu0 %v1779_v0  ;;  %v1684_v13 = vld [vmem:[%s2203_s5] sm:$0xff]  }
 0x581   :  { %v918_v50 = vpop.f32.mrb[24].mxu1 }
 0x582   :  { %v1601_v51 = vpop.f32.mrb[25].mxu1 }
 0x583   :  { %v921_v20 = vpop.f32.mrb[26].mxu1 }
 0x584   :  { %v1602_v52 = vpop.f32.mrb[27].mxu1 }
 0x586   :  { %v966_v55 = vpop.f32.mrb[28].mxu0 }
 0x587   :  { %v1668_v56 = vpack.i.bf16 %v966_v55, %v918_v50  ;;  %v1607_v57 = vpop.f32.mrb[29].mxu0 }
 0x588   :  { %v969_v59 = vpop.f32.mrb[30].mxu0 }
 0x589   :  { %1669 = vrot.lane.b32.xlu1 %v1668_v56, %s1786_s12  ;;  %v1608_v60 = vpop.f32.mrb[31].mxu0  ;;  %v1014_v61 = vpop.f32.mrb[28].mxu1 }
 0x58a   :  { %v1613_v25 = vpop.f32.mrb[29].mxu1  ;;  %v1456_v60 = vld [vmem:[%s2205_s7 + $0x2] ss:$0 sm:$0xff] }
 0x58b   :  { %v1017_v28 = vpop.f32.mrb[30].mxu1 }
 0x58c   :  { %v1614_v62 = vpop.f32.mrb[31].mxu1 }
 0x58e   :  { %v1062_v1 = vpop.f32.mrb[32].mxu0 }
 0x58f   :  { %v1673_v2 = vpack.i.bf16 %v1062_v1, %v1014_v61  ;;  %v1619_v5 = vpop.f32.mrb[33].mxu0  ;;  %v1686_v1 = vld [vmem:[%s2203_s5 + $0x10] sm:$0xff]  }
 0x590   :  { %v1065_v6 = vpop.f32.mrb[34].mxu0  ;;  %v1457_v5 = vld [vmem:[%s2204_s6] ss:$0 sm:$0xff] }
 0x591   :  { %1674 = vrot.lane.b32.xlu0 %v1673_v2, %s1787_s13  ;;  %v1620_v8 = vpop.f32.mrb[35].mxu0  ;;  %v1687_v2 = vld [vmem:[%s2203_s5 + $0x18] sm:$0xff]  }
 0x5c5   :  { %v1665_v9 = vpop.permute.xlu0 %1664 }
 0x5c6   :  { %v1667_v12 = vunpack.i.h.bf16 %v1665_v9  ;;  %v1666_v17 = vunpack.i.l.bf16 %v1665_v9 }
 0x5c8   :  { %v1093_v14 = vsel %vm136_vm2, %v774_v37, %v1667_v12  ;;  %v1092_v18 = vsel %vm136_vm2, %v726_v11, %v1666_v17 }
 0x5fb   :  { %v1670_v10 = vpop.permute.xlu1 %1669 }
 0x5fc   :  { %v1672_v15 = vunpack.i.h.bf16 %v1670_v10  ;;  %v1671_v21 = vunpack.i.l.bf16 %v1670_v10 }
 0x5fe   :  { %v1096_v44 = vsel %vm1094_vm7, %v1093_v14, %v1672_v15  ;;  %v1095_v43 = vsel %vm1094_vm7, %v1092_v18, %v1671_v21 }
 0x603   :  { %v1675_v16 = vpop.permute.xlu0 %1674 }
 0x604   :  { %v1677_v19 = vunpack.i.h.bf16 %v1675_v16  ;;  %v1676_v23 = vunpack.i.l.bf16 %v1675_v16 }
 0x606   :  { %v1099_v26 = vsel %vm1097_vm8, %v1096_v44, %v1677_v19  ;;  %v1098_v27 = vsel %vm1097_vm8, %v1095_v43, %v1676_v23 }
 0x607   :  { %v1106_v29 = vpack.c.bf16 %v1099_v26, %v1098_v27 }
 0x609   :  { %1626 = vmatmul.mubr.msk.bf16.vlgmr.msra.gmra.mrb[32].mxu1 %vm71_vm1, %v1106_v29 }
 0x60a   :  { %1645 = vmatprep.mubr.msk.bf16.mxu1 %vm1780_vm0, %v1779_v0  ;;  %1638 = vmatpush3.bf16.msra.mxu1 %v1684_v13  ;;  %vm1319_vm0 = vcmask 523264  }
 0x60b   :  { %1639 = vmatprep.subr.bf16.mxu1 %v1779_v0 }
 0x60e   :  { %1640 = vmatpush3.bf16.msra.mxu1 %v1685_v22 }
 0x60f   :  { %1641 = vmatprep.subr.bf16.mxu1 %v1779_v0 }
 0x612   :  { %1642 = vmatpush3.bf16.msra.mxu1 %v1686_v1 }
 0x613   :  { %1643 = vmatprep.subr.bf16.mxu1 %v1779_v0  ;;  %v1461_v0 = vld [vmem:[%s2205_s7 + $0x3] ss:$0 sm:$0xff] }
 0x616   :  { %1644 = vmatpush3.bf16.msra.mxu1 %v1687_v2 }
 0x6dc   :  { %v1164_v31 = vpop.f32.mrb[32].mxu1 }
 0x6dd   :  { %v1165_v32 = vadd.f32 %v1451_v30, %v1164_v31  ;;  %v1627_v33 = vpop.f32.mrb[33].mxu1 }
 0x6de   :  { %v1167_v34 = vpop.f32.mrb[34].mxu1 }
 0x6df   :  { %v1168_v35 = vadd.f32 %v1451_v30, %v1167_v34  ;;  %v1628_v36 = vpop.f32.mrb[35].mxu1  ;;  %v1171_v53 = vadd.f32 %v1165_v32, %v1864_v3 }
 0x6e1   :  { %v1173_v11 = vsel %vm71_vm1, %v1171_v53, 0.0  ;;  %v1172_v37 = vadd.f32 %v1168_v35, %v1869_v4  ;;  %v1683_v4 = vld [vmem:[#allocation2 + $0x8] sm:$0xff]  }
 0x6e2   :  { %1174 = vadd.xlane.f32.xlu1 %v1173_v11  ;;  %1632 = vmatpush3.bf16.msra.mxu0 %v1683_v4 }
 0x6e3   :  { %v1176_v38 = vsel %vm71_vm1, %v1172_v37, 0.0 }
 0x6e4   :  { %1177 = vadd.xlane.f32.xlu0 %v1176_v38 }
 0x76f   :  { %v1175_v39 = vpop.xlane.xlu1 %1174 }
 0x770   :  { %v1180_v58 = vmul.f32 0.03125, %v1175_v39 }
 0x771   :  { %v1178_v40 = vpop.xlane.xlu0 %1177 }
 0x772   :  { %v1182_v41 = vsub.f32 %v1171_v53, %v1180_v58  ;;  %v1181_v42 = vmul.f32 0.03125, %v1178_v40 }
 0x774   :  { %v1183_v45 = vsub.f32 %v1172_v37, %v1181_v42  ;;  %v1184_v46 = vmul.f32 %v1182_v41, %v1182_v41 }
 0x776   :  { %v1186_v63 = vsel %vm71_vm1, %v1184_v46, 0.0  ;;  %v1185_v47 = vmul.f32 %v1183_v45, %v1183_v45 }
 0x777   :  { %1187 = vadd.xlane.f32.xlu0 %v1186_v63  ;;  %v1467_v63 = vld [vmem:[%s2205_s7 + $0x4] ss:$0 sm:$0xff] }
 0x778   :  { %v1189_v3 = vsel %vm71_vm1, %v1185_v47, 0.0 }
 0x779   :  { %1190 = vadd.xlane.f32.xlu1 %v1189_v3 }
 0x804   :  { %v1188_v24 = vpop.xlane.xlu0 %1187 }
 0x805   :  { %v1192_v48 = vmul.f32 0.03125, %v1188_v24 }
 0x806   :  { %v1191_v49 = vpop.xlane.xlu1 %1190 }
 0x807   :  { %v1194_v50 = vadd.f32 1e-05, %v1192_v48  ;;  %v1193_v51 = vmul.f32 0.03125, %v1191_v49 }
 0x809   :  { %1720 = vrsqrt.f32 %v1194_v50  ;;  %v1195_v20 = vadd.f32 1e-05, %v1193_v51 }
 0x80b   :  { %1722 = vrsqrt.f32 %v1195_v20 }
 0x813   :  { %v1721_v52 = vpop.eup %1720 }
 0x814   :  { %v1198_v55 = vmul.f32 %v1721_v52, %v1182_v41 }
 0x815   :  { %v1723_v56 = vpop.eup %1722 }
 0x816   :  { %v1204_v57 = vmul.f32 %v1455_v54, %v1198_v55  ;;  %v1199_v59 = vmul.f32 %v1723_v56, %v1183_v45 }
 0x818   :  { %v1205_v61 = vmul.f32 %v1455_v54, %v1199_v59  ;;  %v1210_v25 = vadd.f32 %v1456_v60, %v1204_v57 }
 0x81a   :  { %v1211_v28 = vadd.f32 %v1456_v60, %v1205_v61 }
 0x81c   :  { %v1212_v62 = vpack.c.bf16 %v1211_v28, %v1210_v25 }
 0x81e   :  { %1634 = vmatmul.mubr.msk.bf16.vlgmr.msra.gmra.mrb[36].mxu0 %vm71_vm1, %v1212_v62 }
 0x8f1   :  { %v1273_v6 = vpop.f32.mrb[36].mxu0 }
 0x8f2   :  { %v1274_v8 = vadd.f32 %v1457_v5, %v1273_v6  ;;  %v1635_v9 = vpop.f32.mrb[37].mxu0 }
 0x8f3   :  { %v1276_v10 = vpop.f32.mrb[38].mxu0 }
 0x8f4   :  { %v1277_v12 = vadd.f32 %v1457_v5, %v1276_v10  ;;  %v1636_v17 = vpop.f32.mrb[39].mxu0  ;;  %v1280_v15 = vmax.f32 %v1274_v8, 0.0 }
 0x8f6   :  { %v1281_v21 = vmax.f32 %v1277_v12, 0.0 }
 0x8f8   :  { %v1282_v16 = vpack.c.bf16 %v1281_v21, %v1280_v15 }
 0x8fa   :  { %1646 = vmatmul.mubr.msk.bf16.vlgmr.msra.gmra.mrb[36].mxu1 %vm1319_vm0, %v1282_v16 }
 0x9cd   :  { %v1357_v14 = vpop.f32.mrb[36].mxu1 }
 0x9ce   :  { %v1358_v18 = vadd.f32 %v1461_v0, %v1357_v14  ;;  %v1647_v19 = vpop.f32.mrb[37].mxu1 }
 0x9cf   :  { %v1360_v23 = vpop.f32.mrb[38].mxu1 }
 0x9d0   :  { %v1361_v44 = vadd.f32 %v1461_v0, %v1360_v23  ;;  %v1648_v43 = vpop.f32.mrb[39].mxu1  ;;  %v1364_v26 = vadd.f32 %v1358_v18, %v1210_v25 }
 0x9d2   :  { %v1366_v27 = vsel %vm71_vm1, %v1364_v26, 0.0  ;;  %v1365_v29 = vadd.f32 %v1361_v44, %v1211_v28 }
 0x9d3   :  { %1367 = vadd.xlane.f32.xlu0 %v1366_v27 }
 0x9d4   :  { %v1369_v30 = vsel %vm71_vm1, %v1365_v29, 0.0 }
 0x9d5   :  { %1370 = vadd.xlane.f32.xlu1 %v1369_v30 }
 0xa60   :  { %v1368_v31 = vpop.xlane.xlu0 %1367 }
 0xa61   :  { %v1372_v32 = vmul.f32 0.03125, %v1368_v31 }
 0xa62   :  { %v1371_v33 = vpop.xlane.xlu1 %1370 }
 0xa63   :  { %v1374_v34 = vsub.f32 %v1364_v26, %v1372_v32  ;;  %v1373_v35 = vmul.f32 0.03125, %v1371_v33 }
 0xa65   :  { %v1375_v36 = vsub.f32 %v1365_v29, %v1373_v35  ;;  %v1376_v53 = vmul.f32 %v1374_v34, %v1374_v34 }
 0xa67   :  { %v1378_v11 = vsel %vm71_vm1, %v1376_v53, 0.0  ;;  %v1377_v37 = vmul.f32 %v1375_v36, %v1375_v36 }
 0xa68   :  { %1379 = vadd.xlane.f32.xlu0 %v1378_v11 }
 0xa69   :  { %v1381_v38 = vsel %vm71_vm1, %v1377_v37, 0.0 }
 0xa6a   :  { %1382 = vadd.xlane.f32.xlu1 %v1381_v38 }
 0xaf5   :  { %v1380_v39 = vpop.xlane.xlu0 %1379 }
 0xaf6   :  { %v1384_v58 = vmul.f32 0.03125, %v1380_v39 }
 0xaf7   :  { %v1383_v40 = vpop.xlane.xlu1 %1382 }
 0xaf8   :  { %v1386_v41 = vadd.f32 1e-05, %v1384_v58  ;;  %v1385_v42 = vmul.f32 0.03125, %v1383_v40 }
 0xafa   :  { %1724 = vrsqrt.f32 %v1386_v41  ;;  %v1387_v45 = vadd.f32 1e-05, %v1385_v42 }
 0xafc   :  { %1726 = vrsqrt.f32 %v1387_v45 }
 0xb04   :  { %v1725_v46 = vpop.eup %1724 }
 0xb05   :  { %v1390_v47 = vmul.f32 %v1725_v46, %v1374_v34 }
 0xb06   :  { %v1727_v3 = vpop.eup %1726 }
 0xb07   :  { %v1396_v4 = vmul.f32 %v1467_v63, %v1390_v47  ;;  %v1391_v13 = vmul.f32 %v1727_v3, %v1375_v36 }
 0xb09   :  { %v1397_v22 = vmul.f32 %v1467_v63, %v1391_v13  ;;  %v1402_v24 = vadd.f32 %v1468_v7, %v1396_v4 }
 0xb0b   :  { %v1403_v48 = vadd.f32 %v1468_v7, %v1397_v22  ;;  %1404 = vst.msk [vmem:[#allocation5] sm:$0xff] %vm71_vm1, %v1402_v24 }
 0xb0d   :  { %1405 = vst.msk [vmem:[#allocation5 + $0x8] sm:$0xff] %vm71_vm1, %v1403_v48 }
 0xb0e   :  { %1761 = shalt.err (!%p1758_p12)
}
 0xb0f   :  { %s1762_s12 = scalar_lea.hbm %s2206_s8, 256 }
 0xb10   :  { %p1763_p13 = scmp.ne.s32.totalorder %s2206_s8, %s1762_s12  ;;  %p1766_p0 = scmp.lt.u32.totalorder %s1762_s12, %s2206_s8 }
 0xb12   :  { %p1768_p1 = pnand %p1766_p0, %p1763_p13 }
 0xb14   :  { %1771 = shalt.err (!%p1768_p1)
}
 0xb15   :  { %s1789_s16 = smov 128  }
 0xb16   :  { %1417 = dma.vmem_to_hbm [thread:$0]  %s1412_s9, 256, %s2206_s8, [#allocation4], %s1789_s16, %s1789_s16, %s1785_s29  }
 0xb17   :  { %1774 = dma.done.wait [#allocation4], 256  }
 0xb18   :  { %1775 = vsyncadd [#allocation4], 4294967040 }
 0xb19   :  { %1421 = vsyncpa [#allocation3], 1 }
 0xb1a   :  { %1422 = vsyncpa [#allocation4], 1 }

</bundles_post_ra>
